<compile_context>
chip_gen: v7x
topology: tpu7x:2x2x1
jax: 0.10.0
libtpu: 0.0.40
codegen_flags: <defaults>
</compile_context>

<pallas_src>
import jax
import jax.numpy as jnp
from jax.experimental import pallas as pl
from jax.experimental.pallas import tpu as pltpu


def _round_up(x, m):
    return ((x + m - 1) // m) * m


def _make_sge_kernel(hw_true):
    inv_hw = 1.0 / hw_true
    inv_nm1 = (1.0 / (hw_true - 1)) if hw_true > 1 else float("nan")

    def kernel(x_ref, w_ref, b_ref, o_ref):
        # x_ref, o_ref : VMEM block (TB, cpg, hw)
        # w_ref, b_ref : SMEM (groups,) tables; this block's group = program_id(1)
        g = pl.program_id(1)
        w = w_ref[g]                                        # scalar
        bparam = b_ref[g]                                   # scalar

        x = x_ref[...].astype(jnp.float32)                  # (TB, cpg, hw)

        # adaptive avg pool (1x1) per channel of the group
        avg = jnp.sum(x, axis=-1, keepdims=True) * inv_hw   # (TB, cpg, 1)

        # xn = x * avg_pool(x), summed over the group's channels (sublane reduce)
        t = jnp.sum(x * avg, axis=1, keepdims=True)         # (TB, 1, hw)

        # normalize over spatial positions (torch .std() is unbiased: /(n-1))
        t_mean = jnp.sum(t, axis=-1, keepdims=True) * inv_hw  # (TB, 1, 1)
        tc = t - t_mean
        var = jnp.sum(tc * tc, axis=-1, keepdims=True) * inv_nm1
        std = jnp.sqrt(var) + 1e-5                           # (TB, 1, 1)

        # fold 1/std into the scalar group weight; exact reciprocal keeps the
        # 1e-5 tolerance vs. the exact-division reference
        scale = w * pl.reciprocal(std, approx=False)         # (TB, 1, 1)
        gate = jax.nn.sigmoid(tc * scale + bparam)           # (TB, 1, hw)

        # broadcast the per-group gate across the group's channels
        o_ref[...] = (x * gate).astype(o_ref.dtype)

    return kernel


def _pick_batch_block(b, padded_row_bytes, target_bytes):
    tb = int(max(1, min(b, target_bytes // max(1, padded_row_bytes))))
    # keep TB a divisor of b so every block is full (no ragged leading blocks)
    while b % tb:
        tb -= 1
    return tb


def spatial_group_enhance(x, weight, bias, groups, *,
                          target_block_bytes=2 * 1024 * 1024):
    """x: (b, c, h, w); weight, bias: (1, groups, 1, 1)."""
    b, c, h, w = x.shape
    assert c % groups == 0, "channels must be divisible by groups"
    cpg = c // groups
    hw = h * w

    xg = x.reshape(b, groups, cpg, hw)
    w_g = weight.reshape(groups).astype(jnp.float32)
    b_g = bias.reshape(groups).astype(jnp.float32)

    # ---- block sizing from PADDED VMEM bytes (sublane/lane tile padding) ----
    itemsize = x.dtype.itemsize
    sublane_pack = max(8, 32 // itemsize)          # 8 (f32), 16 (bf16), 32 (i8)
    cpg_pad = _round_up(cpg, sublane_pack)
    hw_pad = _round_up(hw, 128)
    padded_row_bytes = cpg_pad * hw_pad * itemsize            # one (batch,group) row
    padded_row_bytes_f32 = _round_up(cpg, 8) * hw_pad * 4     # in-kernel f32 temps

    tb = _pick_batch_block(b, padded_row_bytes, target_block_bytes)
    grid = (b // tb, groups)          # >= groups steps -> megacore + pipelining

    # ---- VMEM budget from padded block sizes: double-buffered in + out,
    #      f32 upcast + gated temporary, (TB,1,hw) intermediates, margin ----
    x_block_bytes = tb * padded_row_bytes
    f32_block_bytes = tb * padded_row_bytes_f32
    inter_bytes = 8 * tb * 8 * hw_pad * 4
    vmem_needed = 4 * x_block_bytes + 2 * f32_block_bytes + inter_bytes + (4 << 20)
    vmem_limit = int(min(max(vmem_needed, 16 << 20), 64 << 20))

    kernel = _make_sge_kernel(hw)

    out = pl.pallas_call(
        kernel,
        out_shape=jax.ShapeDtypeStruct((b, groups, cpg, hw), x.dtype),
        grid=grid,
        in_specs=[
            pl.BlockSpec((tb, None, cpg, hw), lambda i, g: (i, g, 0, 0)),
            pl.BlockSpec(memory_space=pltpu.MemorySpace.SMEM),
            pl.BlockSpec(memory_space=pltpu.MemorySpace.SMEM),
        ],
        out_specs=pl.BlockSpec((tb, None, cpg, hw), lambda i, g: (i, g, 0, 0)),
        compiler_params=pltpu.CompilerParams(
            dimension_semantics=("parallel", "parallel"),
            vmem_limit_bytes=vmem_limit,
        ),
    )(xg, w_g, b_g)

    return out.reshape(b, c, h, w)


def _reference_sge(x, weight, bias, groups):
    # pure-JAX reference mirroring the PyTorch forward exactly
    b, c, h, w = x.shape
    xg = x.reshape(b * groups, c // groups, h, w)
    avg = xg.mean(axis=(2, 3), keepdims=True)
    xn = (xg * avg).sum(axis=1, keepdims=True)
    t = xn.reshape(b * groups, -1)
    t = t - t.mean(axis=1, keepdims=True)
    std = jnp.std(t, axis=1, keepdims=True, ddof=1) + 1e-5
    t = t / std
    t = t.reshape(b, groups, h, w)
    t = t * weight + bias
    t = t.reshape(b * groups, 1, h, w)
    out = xg * jax.nn.sigmoid(t)
    return out.reshape(b, c, h, w)


if __name__ == "__main__":
    groups = 8                          # module default
    b, c, h, w = 2, 32, 16, 16          # c divisible by groups

    key = jax.random.PRNGKey(0)
    kx, kw, kb = jax.random.split(key, 3)
    x = jax.random.normal(kx, (b, c, h, w), dtype=jnp.float32)
    # deterministic (nonzero) parameter init; module __init__ uses zeros of the
    # same shape — nonzero values exercise the affine+gate path.
    weight = 0.1 * jax.random.normal(kw, (1, groups, 1, 1), dtype=jnp.float32)
    bias = 0.1 * jax.random.normal(kb, (1, groups, 1, 1), dtype=jnp.float32)

    out = spatial_group_enhance(x, weight, bias, groups)
    out = jax.block_until_ready(out)

    ref = _reference_sge(x, weight, bias, groups)
    assert out.shape == (b, c, h, w)
    assert jnp.allclose(out, ref, atol=1e-5, rtol=1e-5), (
        float(jnp.max(jnp.abs(out - ref)))
    )
    print("KERNEL_OK")
</pallas_src>

<mosaic_0001>
module attributes {stable_mosaic.version = 11 : i64} {
  func.func @kernel(%arg0: i32, %arg1: i32, %arg2: memref<2x1x4x256xf32, #tpu.memory_space<vmem>>, %arg3: memref<8xf32, #tpu.memory_space<smem>>, %arg4: memref<8xf32, #tpu.memory_space<smem>>, %arg5: memref<2x1x4x256xf32, #tpu.memory_space<vmem>>) attributes {dimension_semantics = [#tpu.dimension_semantics<parallel>, #tpu.dimension_semantics<parallel>], iteration_bounds = array<i64: 1, 8>, scalar_prefetch = 0 : i64, scratch_operands = 0 : i64, tpu.core_type = #tpu.core_type<tc>, window_params = [{transform_indices = @transform_0, window_bounds = array<i64: 2, 1, 4, 256>}, {transform_indices = @transform_1, window_bounds = array<i64: 8>}, {transform_indices = @transform_2, window_bounds = array<i64: 8>}, {transform_indices = @transform_3, window_bounds = array<i64: 2, 1, 4, 256>}]} {
    %0 = arith.index_cast %arg1 : i32 to index
    %1 = memref.load %arg3[%0] : memref<8xf32, #tpu.memory_space<smem>>
    %2 = arith.index_cast %arg1 : i32 to index
    %3 = memref.load %arg4[%2] : memref<8xf32, #tpu.memory_space<smem>>
    %c0 = arith.constant 0 : index
    %c0_0 = arith.constant 0 : index
    %c0_1 = arith.constant 0 : index
    %c0_2 = arith.constant 0 : index
    %4 = vector.load %arg2[%c0, %c0_0, %c0_1, %c0_2] : memref<2x1x4x256xf32, #tpu.memory_space<vmem>>, vector<2x1x4x256xf32>
    %5 = vector.shape_cast %4 : vector<2x1x4x256xf32> to vector<2x4x256xf32>
    %cst = arith.constant dense<0.000000e+00> : vector<2x4xf32>
    %6 = vector.multi_reduction <add>, %5, %cst [2] : vector<2x4x256xf32> to vector<2x4xf32>
    %7 = vector.shape_cast %6 : vector<2x4xf32> to vector<2x4x1xf32>
    %cst_3 = arith.constant 3.906250e-03 : f32
    %8 = vector.broadcast %cst_3 : f32 to vector<2x4x1xf32>
    %9 = arith.mulf %7, %8 : vector<2x4x1xf32>
    %10 = vector.broadcast %9 : vector<2x4x1xf32> to vector<2x4x256xf32>
    %11 = arith.mulf %5, %10 : vector<2x4x256xf32>
    %cst_4 = arith.constant dense<0.000000e+00> : vector<2x256xf32>
    %12 = vector.multi_reduction <add>, %11, %cst_4 [1] : vector<2x4x256xf32> to vector<2x256xf32>
    %13 = vector.shape_cast %12 : vector<2x256xf32> to vector<2x1x256xf32>
    %cst_5 = arith.constant dense<0.000000e+00> : vector<2x1xf32>
    %14 = vector.multi_reduction <add>, %13, %cst_5 [2] : vector<2x1x256xf32> to vector<2x1xf32>
    %15 = vector.shape_cast %14 : vector<2x1xf32> to vector<2x1x1xf32>
    %cst_6 = arith.constant 3.906250e-03 : f32
    %16 = vector.broadcast %cst_6 : f32 to vector<2x1x1xf32>
    %17 = arith.mulf %15, %16 : vector<2x1x1xf32>
    %18 = vector.broadcast %17 : vector<2x1x1xf32> to vector<2x1x256xf32>
    %19 = arith.subf %13, %18 : vector<2x1x256xf32>
    %20 = arith.mulf %19, %19 : vector<2x1x256xf32>
    %cst_7 = arith.constant dense<0.000000e+00> : vector<2x1xf32>
    %21 = vector.multi_reduction <add>, %20, %cst_7 [2] : vector<2x1x256xf32> to vector<2x1xf32>
    %22 = vector.shape_cast %21 : vector<2x1xf32> to vector<2x1x1xf32>
    %cst_8 = arith.constant 0.00392156886 : f32
    %23 = vector.broadcast %cst_8 : f32 to vector<2x1x1xf32>
    %24 = arith.mulf %22, %23 : vector<2x1x1xf32>
    %25 = math.sqrt %24 : vector<2x1x1xf32>
    %cst_9 = arith.constant 9.99999974E-6 : f32
    %26 = vector.broadcast %cst_9 : f32 to vector<2x1x1xf32>
    %27 = arith.addf %25, %26 : vector<2x1x1xf32>
    %28 = tpu.reciprocal %27 : vector<2x1x1xf32> -> vector<2x1x1xf32>
    %29 = vector.broadcast %1 : f32 to vector<2x1x1xf32>
    %30 = arith.mulf %29, %28 : vector<2x1x1xf32>
    %31 = vector.broadcast %30 : vector<2x1x1xf32> to vector<2x1x256xf32>
    %32 = arith.mulf %19, %31 : vector<2x1x256xf32>
    %33 = vector.broadcast %3 : f32 to vector<2x1x256xf32>
    %34 = arith.addf %32, %33 : vector<2x1x256xf32>
    %35 = arith.negf %34 : vector<2x1x256xf32>
    %36 = math.exp %35 : vector<2x1x256xf32>
    %cst_10 = arith.constant 1.000000e+00 : f32
    %37 = vector.broadcast %cst_10 : f32 to vector<2x1x256xf32>
    %38 = arith.addf %37, %36 : vector<2x1x256xf32>
    %39 = arith.divf %37, %38 : vector<2x1x256xf32>
    %40 = vector.broadcast %39 : vector<2x1x256xf32> to vector<2x4x256xf32>
    %41 = arith.mulf %5, %40 : vector<2x4x256xf32>
    %c0_11 = arith.constant 0 : index
    %c0_12 = arith.constant 0 : index
    %c0_13 = arith.constant 0 : index
    %c0_14 = arith.constant 0 : index
    %42 = vector.load %arg5[%c0_11, %c0_12, %c0_13, %c0_14] : memref<2x1x4x256xf32, #tpu.memory_space<vmem>>, vector<2x1x4x256xf32>
    %43 = vector.shape_cast %42 : vector<2x1x4x256xf32> to vector<2x4x256xf32>
    %44 = vector.shape_cast %41 : vector<2x4x256xf32> to vector<2x1x4x256xf32>
    tpu.vector_store %arg5[%c0_11, %c0_12, %c0_13, %c0_14], %44 {strides = array<i32>} : memref<2x1x4x256xf32, #tpu.memory_space<vmem>>, vector<2x1x4x256xf32>,
    return
  }
  func.func @transform_0(%arg0: i32, %arg1: i32) -> (i32, i32, i32, i32) {
    %c0_i32 = arith.constant 0 : i32
    %c0_i32_0 = arith.constant 0 : i32
    %c0_i32_1 = arith.constant 0 : i32
    return %arg0, %arg1, %c0_i32, %c0_i32_0 : i32, i32, i32, i32
  }
  func.func @transform_1(%arg0: i32, %arg1: i32) -> i32 {
    %c0_i32 = arith.constant 0 : i32
    %c0_i32_0 = arith.constant 0 : i32
    return %c0_i32 : i32
  }
  func.func @transform_2(%arg0: i32, %arg1: i32) -> i32 {
    %c0_i32 = arith.constant 0 : i32
    %c0_i32_0 = arith.constant 0 : i32
    return %c0_i32 : i32
  }
  func.func @transform_3(%arg0: i32, %arg1: i32) -> (i32, i32, i32, i32) {
    %c0_i32 = arith.constant 0 : i32
    %c0_i32_0 = arith.constant 0 : i32
    %c0_i32_1 = arith.constant 0 : i32
    return %arg0, %arg1, %c0_i32, %c0_i32_0 : i32, i32, i32, i32
  }
}

</mosaic_0001>

<bundles_post_ra>
// kernel: tpu_custom_call.1
= control target key start
LH: loop header
LB: loop body
LE: loop exit
PB: predicated region body
PF: predicated region fallthrough
CT: control target
= control target key end

     0   :  { %8 = vsyncpa [#allocation3], 0  ;;  %s1095_s0 = inlined_call_operand.hbm [shape: f32[2,8,4,256], index: 0, kind: input, shape index: {}]   ;;  %s1096_s1 = inlined_call_operand.vmem [shape: f32[8], index: 1, kind: input, shape index: {}]   ;;  %s1097_s2 = inlined_call_operand.vmem [shape: f32[8], index: 2, kind: input, shape index: {}]   ;;  %s1098_s3 = inlined_call_operand.hbm [shape: f32[2,8,4,256], index: 3, kind: output, shape index: {}]  }
   0x1   :  { %10 = vsyncpa [#allocation3 + $0x1], 0 }
   0x2   :  { %11 = vsyncpa [#allocation5], 0 }
   0x3   :  { %12 = vsyncpa [#allocation8], 0 }
   0x4   :  { %13 = vsyncpa [#allocation4], 0 }
   0x5   :  { %15 = vsyncpa [#allocation4 + $0x1], 0  ;;  %s854_s12 = smov 0   ;;  %s856_s13 = smov 0  }
   0x6   :  { %s858_s14 = smov 0   ;;  %s860_s15 = smov 0  }
   0x7   :  { %s862_s16 = smov 0   ;;  %s864_s17 = smov 0  }
   0x8 LB: > { %s530_s18 = sadd.s32 4294967295, %s821_s17   ;;  %s531_s19 = sadd.s32 4294967294, %s821_s17   ;;  %s821_s17 = sphi %s864_s17, %s21_s17   ;;  %s817_s16 = sphi %s862_s16, %s1123_s16   ;;  %s813_s15 = sphi %s860_s15, %s1122_s15   ;;  %s809_s14 = sphi %s858_s14, %s1121_s14   ;;  %s805_s13 = sphi %s856_s13, %s1120_s13   ;;  %s801_s12 = sphi %s854_s12, %s1119_s12  }
   0x9   : > { %s42_s20 = sadd.s32 1, %s809_s14  ;;  %p49_p0 = scmp.ne.s32.totalorder %s809_s14, %s805_s13 }
   0xa   : > { %p50_p1 = scmp.eq.s32.totalorder %s821_s17, 0  ;;  %p55_p2 = scmp.ne.s32.totalorder %s805_s13, %s801_s12 }
   0xb   : > { %p892_p3 = scmp.eq.s32.totalorder %s530_s18, 0  ;;  %p123_p4 = scmp.eq.s32.totalorder %s530_s18, 7 }
   0xc   : > { %p896_p5 = por %p50_p1, %p49_p0  ;;  %p129_p6 = scmp.eq.s32.totalorder %s531_s19, 7 }
   0xd   : > { %s1105_s21 = scalar_select %p892_p3, 1, 0 }
   0xe   : > { %p902_p7 = por %p892_p3, %p55_p2  ;;  %p906_p8 = por %p123_p4, %p49_p0 }
   0xf   : > { %p910_p9 = por %p129_p6, %p55_p2  ;;  %p532_p10 = scmp.ge.s32.totalorder %s821_s17, 1 }
  0x10   : > { %s1107_s23 = scalar_select %p902_p7, 1, 0 }
  0x11   : > { %s1108_s24 = scalar_select %p906_p8, 1, 0 }
  0x12   : > { %s1109_s25 = scalar_select %p910_p9, 1, 0 }
  0x13   : > { %p136_p11 = scmp.lt.s32.totalorder %s821_s17, 9  ;;  %s149_s28 = sshll.u32 %s1096_s1, 4  ;;  %s150_s28 = int_to_ptr.vmem [resolvable:$true] %s149_s28 }
  0x14   : > { %p584_p13 = scmp.lt.s32.totalorder %s821_s17, 8  ;;  %s160_s5 = sshll.u32 %s1097_s2, 4  ;;  %s161_s5 = int_to_ptr.vmem [resolvable:$true] %s160_s5 }
  0x15   : > { %p919_p12 = pnand %p532_p10, %p136_p11  ;;  %s671_s8 = scalar_lea.vmem %s150_s28, 16 }
  0x16   : > { %p931_p1 = pnand %p584_p13, %p896_p5  ;;  %p672_p4 = scmp.ne.s32.totalorder %s150_s28, %s671_s8 }
  0x17   : > { %s1110_s29 = scalar_select %p919_p12, 1, 0 }
  0x18   : > { %p567_p0 = pneg %p919_p12  ;;  %p679_p9 = scmp.lt.s32.totalorder %s150_s28, %s150_s28 }
  0x19   : > { %s1111_s6 = scalar_select %p931_p1, 1, 0 }
  0x1a   : > { %p937_p2 = pnand %p567_p0, %p892_p3  ;;  %p680_p8 = scmp.lt.s32.totalorder %s671_s8, %s671_s8 }
  0x1c   : > { %p673_p6 = pneg %p937_p2  ;;  %p681_p7 = por %p680_p8, %p679_p9 }
  0x1e   : > { %p674_p10 = pnand %p673_p6, %p672_p4 }
  0x20   : > { %p675_p11 = pneg %p674_p10 }
  0x22   : > { %p682_p5 = pnand %p681_p7, %p675_p11 }
  0x24   : > { %685 = shalt.err (!%p682_p5)
}
  0x25   : > { %s823_s9 = smov [#allocation6]   ;;  %s686_s10 = scalar_lea.vmem %s161_s5, 16 }
  0x26   : > { %570 = dma.vmem_to_smem (!%p937_p2), %s150_s28, 16, %s823_s9, [#allocation5]  }
  0x27   : > { %p687_p13 = scmp.ne.s32.totalorder %s161_s5, %s686_s10  ;;  %p694_p12 = scmp.lt.s32.totalorder %s161_s5, %s161_s5 }
  0x28   : > { %p695_p1 = scmp.lt.s32.totalorder %s686_s10, %s686_s10 }
  0x29   : > { %p689_p0 = pnand %p687_p13, %p673_p6 }
  0x2a   : > { %p696_p4 = por %p695_p1, %p694_p12 }
  0x2b   : > { %p690_p3 = pneg %p689_p0 }
  0x2d   : > { %p697_p10 = pnand %p696_p4, %p690_p3 }
  0x2f   : > { %700 = shalt.err (!%p697_p10)
}
  0x30   : > { %s824_s11 = smov [#allocation7]   ;;  %s30_s18 = sadd.s32 1, %s817_s16 }
  0x31   : > { %573 = dma.vmem_to_smem (!%p937_p2), %s161_s5, 16, %s824_s11, [#allocation8]  }
  0x32   : > { %s171_s19 = sand.u32 1, %s809_s14   ;;  %p31_p7 = scmp.ge.s32.totalorder %s30_s18, 8 }
  0x33   : > { %s536_s22 = sshll.u32 %s171_s19, 4  ;;  %s553_s26 = sshll.u32 %s817_s16, 7 }
  0x34   : > { %s1125_s18 = smov (%p31_p7, %s30_s18), 0  ;;  %s955_s30 = scalar_lea.hbm %s1095_s0, %s553_s26 }
  0x35   : > { %s38_s4 = ssub.s32 %s817_s16, %s1125_s18  ;;  %s175_s5 = scalar_lea.vmem [#allocation2], %s536_s22 }
  0x36   : > { %s185_s7 = sshll.u32 %s175_s5, 4  ;;  %p40_p3 = scmp.eq.s32.totalorder %s38_s4, 0  ;;  %s959_s7 = int_to_ptr.vmem [resolvable:$true] %s185_s7 }
  0x37   : > { %s966_s9 = scalar_lea.sflag [#allocation3], %s171_s19  ;;  %s701_s10 = scalar_lea.hbm %s955_s30, 256 }
  0x38   : > { %s964_s8 = scalar_select %p40_p3, %s809_s14, %s42_s20  }
  0x39   : > { %p702_p8 = scmp.ne.s32.totalorder %s955_s30, %s701_s10  ;;  %p1113_p9 = scmp.ne.s32.totalorder %s1111_s6, 0 }
  0x3a   : > { %s706_s22 = scalar_lea.hbm %s1095_s0, 2048  ;;  %p707_p6 = scmp.lt.u32.totalorder %s955_s30, %s1095_s0 }
  0x3b   : > { %p703_p12 = pneg %p1113_p9  ;;  %p708_p11 = scmp.lt.u32.totalorder %s706_s22, %s701_s10 }
  0x3c   : > { %p710_p13 = scmp.lt.u32.totalorder %s701_s10, %s955_s30 }
  0x3d   : > { %p704_p1 = pnand %p703_p12, %p702_p8  ;;  %p709_p5 = por %p708_p11, %p707_p6 }
  0x3f   : > { %p705_p2 = pneg %p704_p1  ;;  %p711_p0 = por %p710_p13, %p709_p5 }
  0x41   : > { %p712_p4 = pnand %p711_p0, %p705_p2 }
  0x43   : > { %715 = shalt.err (!%p712_p4)
}
  0x44   : > { %s716_s20 = scalar_lea.vmem %s959_s7, 256  ;;  %s825_s19 = smov [#allocation2]  }
  0x45   : > { %p717_p10 = scmp.ne.s32.totalorder %s959_s7, %s716_s20  ;;  %s721_s4 = sshll.u32 %s825_s19, 4  ;;  %s722_s4 = int_to_ptr.vmem [resolvable:$false] %s721_s4 }
  0x46   : > { %s723_s5 = scalar_lea.vmem %s722_s4, 512  ;;  %p724_p8 = scmp.lt.s32.totalorder %s959_s7, %s722_s4 }
  0x47   : > { %p719_p7 = pnand %p717_p10, %p703_p12  ;;  %p725_p1 = scmp.lt.s32.totalorder %s723_s5, %s716_s20 }
  0x49   : > { %p720_p3 = pneg %p719_p7  ;;  %p726_p6 = por %p725_p1, %p724_p8 }
  0x4b   : > { %p727_p11 = pnand %p726_p6, %p720_p3 }
  0x4d   : > { %730 = shalt.err (!%p727_p11)
}
  0x4e   : > { %s826_s10 = smov 1024   ;;  %s827_s11 = smov 128  }
  0x4f   : > { %s828_s26 = smov 8   ;;  %p1114_p12 = scmp.ne.s32.totalorder %s1110_s29, 0 }
  0x50   : > { %577 = dma.hbm_to_vmem [thread:$0]  (!%p1113_p9), %s955_s30, 256, %s959_s7, %s966_s9, %s826_s10, %s827_s11, %s828_s26  }
  0x51   : > { %197 = sbr.rel (%p1114_p12) target bundleno = 646 (0x286), region = 32  ;;  %s997_s22 = sand.u32 (!%p1114_p12), 1, %s805_s13  }
  0x52   : > { %s540_s27 = sshll.u32 (!%p1114_p12), %s997_s22, 4  ;;  %s200_s28 = scalar_lea.sflag (!%p1114_p12), [#allocation3], %s997_s22 }
  0x53   : > { %s203_s20 = scalar_lea.vmem (!%p1114_p12), [#allocation2], %s540_s27  ;;  %p1115_p2 = scmp.ne.s32.totalorder (!%p1114_p12), %s1107_s23, 0 }
  0x58   : > { %784 = dma.done.wait (%p1115_p2), %s200_s28, 256  }
  0x59   : > { %786 = vsyncadd (%p1115_p2), %s200_s28, 4294967040  ;;  %p1116_p9 = scmp.ne.s32.totalorder %s1105_s21, 0 }
  0x5b   : > { %788 = dma.done.wait (%p1116_p9), [#allocation5], 16  }
  0x5c   : > { %790 = vsyncadd (%p1116_p9), [#allocation5], 4294967280 }
  0x5d   : > { %792 = dma.done.wait (%p1116_p9), [#allocation8], 16  }
  0x5e   : > { %794 = vsyncadd (%p1116_p9), [#allocation8], 4294967280 }
  0x5f   : > { %216 = sfence }
  0x60   : > { %v1015_v0 = vld [vmem:[%s203_s20] sm:$0xff]  ;;  %vm247_vm0 = vcmask 1043456   ;;  %v1017_v1 = vld [vmem:[%s203_s20 + $0x8] sm:$0xff]  ;;  %v829_v10 = vmov 839922192   ;;  %v265_v12 = vlaneseq  ;;  %s237_s21 = sld [smem:[#allocation6 + %s813_s15]] }
  0x61   : > { %v243_v2 = vcombine.high %v1015_v0, %v1015_v0  ;;  %v248_v3 = vsel %vm247_vm0, %v1015_v0, 0.0  ;;  %v244_v4 = vcombine.high %v1017_v1, %v1017_v1  ;;  %v253_v6 = vsel %vm247_vm0, %v1017_v1, 0.0  ;;  %s238_s23 = sld [smem:[#allocation7 + %s813_s15]]  ;;  %s554_s29 = sshll.u32 %s813_s15, 7 }
  0x62   : > { %v263_v11 = vunpack.c.l.s4 %v829_v10  ;;  %v266_v14 = vshrl.u32 %v265_v12, 7  ;;  %s234_s6 = scalar_lea.vmem [#allocation9], %s540_s27  ;;  %s1044_s19 = scalar_lea.hbm %s1098_s3, %s554_s29 }
  0x63   : > { %v249_v5 = vsel %vm247_vm0, %v243_v2, 0.0  ;;  %v254_v7 = vsel %vm247_vm0, %v244_v4, 0.0  ;;  %s421_s30 = sshll.u32 %s234_s6, 4  ;;  %s405_s15 = scalar_lea.sflag [#allocation4], %s997_s22  ;;  %s1046_s30 = int_to_ptr.vmem [resolvable:$true] %s421_s30 }
  0x64   : > { %v250_v8 = vadd.f32 %v249_v5, %v248_v3  ;;  %v255_v9 = vadd.f32 %v254_v7, %v253_v6  ;;  %v264_v13 = vunpack.c.0.s8 %v263_v11  ;;  %s731_s4 = scalar_lea.vmem %s1046_s30, 256  ;;  %p1117_p13 = scmp.ne.s32.totalorder %s1108_s24, 0 }
  0x65   : > { %p732_p5 = scmp.ne.s32.totalorder %s1046_s30, %s731_s4  ;;  %s830_s5 = smov [#allocation9]  }
  0x66   : > { %251 = vadd.xlane.f32.xlu0 %v250_v8  ;;  %v267_v15 = vsub.s32 %v264_v13, %v266_v14  ;;  %s735_s10 = sshll.u32 %s830_s5, 4  ;;  %s736_s10 = int_to_ptr.vmem [resolvable:$false] %s735_s10 }
  0x67   : > { %p733_p0 = pnand %p732_p5, %p1117_p13  ;;  %s737_s11 = scalar_lea.vmem %s736_s10, 512 }
  0x68   : > { %p738_p10 = scmp.lt.s32.totalorder %s1046_s30, %s736_s10  ;;  %p739_p7 = scmp.lt.s32.totalorder %s737_s11, %s731_s4 }
  0x69   : > { %p734_p4 = pneg %p733_p0 }
  0x6a   : > { %256 = vadd.xlane.f32.xlu0 %v255_v9  ;;  %p740_p3 = por %p739_p7, %p738_p10 }
  0x6c   : > { %p741_p8 = pnand %p740_p3, %p734_p4 }
  0xf3   : > { %v252_v16 = vpop.xlane.xlu0 %251 }
  0xf4   : > { %v258_v17 = vmul.f32 0.00390625, %v252_v16 }
  0xf6   : > { %v268_v18 = vrot.slane %v258_v17, %v267_v15 }
  0xf7   : > { %v257_v19 = vpop.xlane.xlu0 %256 }
  0xf8   : > { %v278_v20 = vmul.f32 %v268_v18, %v1015_v0  ;;  %v259_v21 = vmul.f32 0.00390625, %v257_v19 }
  0xfa   : > { %v282_v22 = vcombine.high %v278_v20, %v278_v20  ;;  %v286_v23 = vsel %vm247_vm0, %v278_v20, 0.0  ;;  %v275_v24 = vrot.slane %v259_v21, %v267_v15 }
  0xfb   : > { %v287_v25 = vrot.slane %v286_v23, 4 }
  0xfc   : > { %v279_v26 = vmul.f32 %v275_v24, %v1017_v1  ;;  %v293_v27 = vsel %vm247_vm0, %v282_v22, 0.0  ;;  %v356_v24 = vstv %s237_s21 }
  0xfd   : > { %v288_v28 = vadd.f32 %v287_v25, %v286_v23  ;;  %v294_v29 = vrot.slane %v293_v27, 4 }
  0xfe   : > { %v283_v30 = vcombine.high %v279_v26, %v279_v26  ;;  %v300_v31 = vsel %vm247_vm0, %v279_v26, 0.0 }
  0xff   : > { %v301_v32 = vrot.slane %v300_v31, 4  ;;  %v289_v33 = vrot.slane %v288_v28, 2  ;;  %v295_v34 = vadd.f32 %v294_v29, %v293_v27  ;;  %v363_v27 = vstv %s238_s23 }
 0x100   : > { %v307_v35 = vsel %vm247_vm0, %v283_v30, 0.0 }
 0x101   : > { %v290_v36 = vadd.f32 %v289_v33, %v288_v28  ;;  %v296_v37 = vrot.slane %v295_v34, 2  ;;  %v302_v38 = vadd.f32 %v301_v32, %v300_v31  ;;  %v308_v39 = vrot.slane %v307_v35, 4 }
 0x103   : > { %v291_v40 = vrot.slane %v290_v36, 1  ;;  %v297_v41 = vadd.f32 %v296_v37, %v295_v34  ;;  %v303_v42 = vrot.slane %v302_v38, 2  ;;  %v309_v43 = vadd.f32 %v308_v39, %v307_v35 }
 0x105   : > { %v298_v44 = vrot.slane %v297_v41, 1  ;;  %v304_v45 = vadd.f32 %v303_v42, %v302_v38  ;;  %v310_v46 = vrot.slane %v309_v43, 2  ;;  %v292_v47 = vadd.f32 %v291_v40, %v290_v36 }
 0x107   : > { %v299_v48 = vadd.f32 %v298_v44, %v297_v41  ;;  %v305_v49 = vrot.slane %v304_v45, 1  ;;  %v311_v50 = vadd.f32 %v310_v46, %v309_v43 }
 0x109   : > { %v314_v51 = vadd.f32 %v299_v48, %v292_v47  ;;  %v312_v52 = vrot.slane %v311_v50, 1  ;;  %v306_v53 = vadd.f32 %v305_v49, %v304_v45 }
 0x10b   : > { %315 = vadd.xlane.f32.xlu1 %v314_v51  ;;  %v313_v54 = vadd.f32 %v312_v52, %v311_v50 }
 0x10d   : > { %v317_v55 = vadd.f32 %v313_v54, %v306_v53 }
 0x10f   : > { %318 = vadd.xlane.f32.xlu1 %v317_v55 }
 0x198   : > { %v316_v56 = vpop.xlane.xlu1 %315 }
 0x199   : > { %v320_v57 = vmul.f32 0.00390625, %v316_v56 }
 0x19b   : > { %v322_v58 = vsub.f32 %v292_v47, %v320_v57  ;;  %v323_v59 = vsub.f32 %v299_v48, %v320_v57 }
 0x19c   : > { %v319_v60 = vpop.xlane.xlu1 %318 }
 0x19d   : > { %v321_v61 = vmul.f32 0.00390625, %v319_v60  ;;  %v326_v62 = vmul.f32 %v322_v58, %v322_v58  ;;  %v327_v63 = vmul.f32 %v323_v59, %v323_v59 }
 0x19f   : > { %v324_v2 = vsub.f32 %v306_v53, %v321_v61  ;;  %v325_v3 = vsub.f32 %v313_v54, %v321_v61  ;;  %v330_v4 = vadd.f32 %v327_v63, %v326_v62 }
 0x1a1   : > { %331 = vadd.xlane.f32.xlu0 %v330_v4  ;;  %v328_v5 = vmul.f32 %v324_v2, %v324_v2  ;;  %v329_v6 = vmul.f32 %v325_v3, %v325_v3 }
 0x1a3   : > { %v333_v7 = vadd.f32 %v329_v6, %v328_v5 }
 0x1a5   : > { %334 = vadd.xlane.f32.xlu1 %v333_v7 }
 0x22e   : > { %v332_v8 = vpop.xlane.xlu0 %331 }
 0x22f   : > { %v336_v9 = vmul.f32 0.003921569, %v332_v8 }
 0x231   : > { %647 = vrsqrt.f32 %v336_v9  ;;  %vm340_vm1 = vcmp.eq.f32.partialorder %v336_v9, inf  ;;  %v343_v14 = vand.u32 2147483648, %v336_v9  ;;  %vm342_vm2 = vcmp.eq.f32.partialorder %v336_v9, 0.0 }
 0x232   : > { %v335_v10 = vpop.xlane.xlu1 %334 }
 0x233   : > { %v337_v11 = vmul.f32 0.003921569, %v335_v10 }
 0x235   : > { %649 = vrsqrt.f32 %v337_v11  ;;  %vm347_vm3 = vcmp.eq.f32.partialorder %v337_v11, inf  ;;  %v350_v20 = vand.u32 2147483648, %v337_v11  ;;  %vm349_vm4 = vcmp.eq.f32.partialorder %v337_v11, 0.0 }
 0x23b   : > { %v648_v12 = vpop.eup %647 }
 0x23c   : > { %v339_v13 = vmul.f32 %v648_v12, %v336_v9 }
 0x23e   : > { %v341_v15 = vsel %vm340_vm1, %v336_v9, %v339_v13 }
 0x23f   : > { %v650_v16 = vpop.eup %649  ;;  %v344_v17 = vsel %vm342_vm2, %v343_v14, %v341_v15 }
 0x240   : > { %v352_v18 = vadd.f32 1e-05, %v344_v17  ;;  %v346_v19 = vmul.f32 %v650_v16, %v337_v11 }
 0x242   : > { %651 = vrcp.f32 %v352_v18  ;;  %v348_v21 = vsel %vm347_vm3, %v337_v11, %v346_v19 }
 0x243   : > { %v351_v22 = vsel %vm349_vm4, %v350_v20, %v348_v21 }
 0x244   : > { %v353_v23 = vadd.f32 1e-05, %v351_v22 }
 0x246   : > { %653 = vrcp.f32 %v353_v23 }
 0x24c   : > { %v652_v25 = vpop.eup %651 }
 0x24d   : > { %v357_v26 = vmul.f32 %v652_v25, %v356_v24 }
 0x24f   : > { %v359_v28 = vmul.f32 %v357_v26, %v322_v58  ;;  %v360_v29 = vmul.f32 %v357_v26, %v323_v59 }
 0x250   : > { %v654_v30 = vpop.eup %653 }
 0x251   : > { %v358_v31 = vmul.f32 %v654_v30, %v356_v24  ;;  %v364_v32 = vadd.f32 %v363_v27, %v359_v28  ;;  %v365_v33 = vadd.f32 %v363_v27, %v360_v29 }
 0x253   : > { %v361_v34 = vmul.f32 %v358_v31, %v324_v2  ;;  %v362_v35 = vmul.f32 %v358_v31, %v325_v3  ;;  %v544_v36 = vmul.f32 -1.442695, %v364_v32  ;;  %v545_v37 = vmul.f32 -1.442695, %v365_v33 }
 0x255   : > { %v366_v38 = vadd.f32 %v363_v27, %v361_v34  ;;  %v367_v39 = vadd.f32 %v363_v27, %v362_v35  ;;  %655 = vpow2.f32 %v544_v36 }
 0x256   : > { %657 = vpow2.f32 %v545_v37 }
 0x257   : > { %v546_v40 = vmul.f32 -1.442695, %v366_v38  ;;  %v547_v41 = vmul.f32 -1.442695, %v367_v39 }
 0x259   : > { %659 = vpow2.f32 %v546_v40 }
 0x25a   : > { %661 = vpow2.f32 %v547_v41 }
 0x25f   : > { %v656_v42 = vpop.eup %655 }
 0x260   : > { %v658_v43 = vpop.eup %657  ;;  %v380_v44 = vadd.f32 1.0, %v656_v42 }
 0x261   : > { %v381_v45 = vadd.f32 1.0, %v658_v43 }
 0x262   : > { %663 = vrcp.f32 %v380_v44 }
 0x263   : > { %v660_v46 = vpop.eup %659  ;;  %665 = vrcp.f32 %v381_v45 }
 0x264   : > { %v662_v47 = vpop.eup %661  ;;  %v382_v48 = vadd.f32 1.0, %v660_v46 }
 0x265   : > { %v383_v49 = vadd.f32 1.0, %v662_v47 }
 0x266   : > { %667 = vrcp.f32 %v382_v48 }
 0x267   : > { %669 = vrcp.f32 %v383_v49 }
 0x26c   : > { %v664_v50 = vpop.eup %663 }
 0x26d   : > { %v666_v51 = vpop.eup %665 }
 0x26e   : > { %v396_v52 = vcombine.low %v664_v50, %v666_v51 }
 0x270   : > { %v668_v53 = vpop.eup %667  ;;  %v400_v54 = vmul.f32 %v396_v52, %v1015_v0 }
 0x271   : > { %v670_v55 = vpop.eup %669 }
 0x272   : > { %v397_v56 = vcombine.low %v668_v53, %v670_v55  ;;  %402 = vst [vmem:[%s234_s6] sm:$0xff] %v400_v54 }
 0x274   : > { %v401_v57 = vmul.f32 %v397_v56, %v1017_v1 }
 0x276   : > { %403 = vst [vmem:[%s234_s6 + $0x8] sm:$0xff] %v401_v57 }
 0x277   : > { %744 = shalt.err (!%p741_p8)
}
 0x278   : > { %s745_s26 = scalar_lea.hbm %s1044_s19, 256  ;;  %s749_s20 = scalar_lea.hbm %s1098_s3, 2048 }
 0x279   : > { %p746_p1 = scmp.ne.s32.totalorder %s1044_s19, %s745_s26  ;;  %p750_p12 = scmp.lt.u32.totalorder %s1044_s19, %s1098_s3 }
 0x27a   : > { %p751_p2 = scmp.lt.u32.totalorder %s749_s20, %s745_s26  ;;  %p753_p5 = scmp.lt.u32.totalorder %s745_s26, %s1044_s19 }
 0x27b   : > { %p747_p6 = pnand %p746_p1, %p1117_p13 }
 0x27c   : > { %p752_p9 = por %p751_p2, %p750_p12 }
 0x27d   : > { %p748_p11 = pneg %p747_p6 }
 0x27e   : > { %p754_p0 = por %p753_p5, %p752_p9 }
 0x280   : > { %p755_p4 = pnand %p754_p0, %p748_p11 }
 0x282   : > { %758 = shalt.err (!%p755_p4)
}
 0x283   : > { %s831_s29 = smov 128   ;;  %s832_s6 = smov 1024  }
 0x284   : > { %s833_s7 = smov 8  }
 0x285   : > { %565 = dma.vmem_to_hbm [thread:$0]  (%p1117_p13), %s1046_s30, 256, %s1044_s19, %s405_s15, %s831_s29, %s832_s6, %s833_s7  }
 0x286 PF: > { %p587_p10 = scmp.ge.s32.totalorder %s821_s17, 2  ;;  %s436_s9 = sand.u32 1, %s801_s12  }
 0x287   : > { %p1118_p7 = scmp.ne.s32.totalorder %s1109_s25, 0  ;;  %s437_s4 = scalar_lea.sflag [#allocation4], %s436_s9 }
 0x289   : > { %p579_p3 = pnand %p587_p10, %p1118_p7 }
 0x28b   : > { %796 = dma.done.wait (!%p579_p3), %s437_s4, 256  }
 0x28c   : > { %798 = vsyncadd (!%p579_p3), %s437_s4, 4294967040  ;;  %s21_s17 = sadd.s32 1, %s821_s17   ;;  %s1119_s12 = smov %s805_s13 }
 0x28d   : > { %p18_p8 = scmp.ge.s32.totalorder %s21_s17, 10   ;;  %s1120_s13 = smov %s809_s14 }
 0x28e   : > { %s1121_s14 = smov %s964_s8  ;;  %s1122_s15 = smov %s817_s16 }
 0x28f   : > { %s1123_s16 = smov %s1125_s18  ;;  %20 = sbr.rel (!%p18_p8) target bundleno = 8 (0x8), region = 86 }
 0x296   :  { %442 = vsyncpa [#allocation3], 1 }
 0x297   :  { %444 = vsyncpa [#allocation3 + $0x1], 1 }
 0x298   :  { %445 = vsyncpa [#allocation4], 1 }
 0x299   :  { %447 = vsyncpa [#allocation4 + $0x1], 1 }
 0x29a   :  { %448 = vsyncpa [#allocation5], 1 }
 0x29b   :  { %450 = vsyncpa [#allocation5 + $0x1], 1 }
 0x29c   :  { %451 = vsyncpa [#allocation8], 1 }

</bundles_post_ra>
